<compile_context>
chip_gen: v7x
topology: tpu7x:2x2x1
jax: 0.10.0
libtpu: 0.0.40
codegen_flags: <defaults>
</compile_context>

<pallas_src>
import functools

import jax
import jax.numpy as jnp
from jax import lax
from jax.experimental import pallas as pl
from jax.experimental.pallas import tpu as pltpu

EMB_DIM = 10
HIDDEN = 128


def _round_up(x, m):
    return (x + m - 1) // m * m


def _recommender_kernel(idx_ref, genres_ref, w_disc_ref, w_gen_ref, tail_ref,
                        out_ref, *, offsets):
    """Fused embedding-gather (one-hot) + fc1 + ReLU + fc2 head.

    idx_ref:    [TB, 4]      int32  packed (age, movie, gender, occupation)
    genres_ref: [TB, G]      f32    multi-hot genres
    w_disc_ref: [K_disc, H]  f32    stacked (emb_table_i @ w1_slice_i)
    w_gen_ref:  [G, H]       f32    wg @ w1[40:50]  (genre Linear folded in)
    tail_ref:   [3, H]       f32    row0 = fused fc1 bias, row1 = fc2 weight,
                                    row2 = fc2 bias (replicated across lanes)
    out_ref:    [TB, 1]      f32
    """
    tb = idx_ref.shape[0]
    k_disc = w_disc_ref.shape[0]

    # Build the combined one-hot matrix for the 4 categorical features in one
    # [TB, K_disc] tile (the four features live in disjoint column ranges, so
    # a simple accumulate is exact).
    lane = lax.broadcasted_iota(jnp.int32, (tb, k_disc), 1)
    idx = idx_ref[...]                                   # [TB, 4] int32
    onehot = jnp.zeros((tb, k_disc), jnp.float32)
    for j, off in enumerate(offsets):                    # unrolled, 4 iters
        col = idx[:, j:j + 1] + off                      # [TB, 1]
        onehot = onehot + (lane == col).astype(jnp.float32)

    b_eff = tail_ref[0:1, :]                             # [1, H] fused fc1 bias
    w2_row = tail_ref[1:2, :]                            # [1, H] fc2 weight
    b2 = tail_ref[2:3, 0:1]                              # [1, 1] fc2 bias

    # fc1 (with embeddings + genre projection pre-folded into the weights).
    h = jnp.dot(onehot, w_disc_ref[...], preferred_element_type=jnp.float32)
    h = h + jnp.dot(genres_ref[...], w_gen_ref[...],
                    preferred_element_type=jnp.float32)
    h = jnp.maximum(h + b_eff, 0.0)                      # ReLU

    # fc2 (N=1): VPU multiply + XLU lane reduction — avoids a wasted MXU
    # matmul with only 1 useful output lane.
    out_ref[...] = jnp.sum(h * w2_row, axis=-1, keepdims=True) + b2


@functools.partial(jax.jit, static_argnames=("offsets", "block_b"))
def federated_recommender_forward(w_disc, w_gen, tail, age_group, movie,
                                  gender, occupation, genres, *,
                                  offsets, block_b=256):
    """Forward pass. `offsets` are the static column offsets of the 4
    categorical features inside w_disc (age, movie, gender, occupation)."""
    B = age_group.shape[0]
    G = genres.shape[1]
    k_disc, hidden = w_disc.shape

    idx = jnp.stack([age_group, movie, gender, occupation],
                    axis=-1).astype(jnp.int32)           # [B, 4]
    genres_f = genres.astype(jnp.float32)

    # Batch tile: multiple of 8 sublanes, capped at block_b for large batches.
    tb = min(block_b, _round_up(B, 8))
    bp = _round_up(B, tb)
    if bp != B:
        idx = jnp.pad(idx, ((0, bp - B), (0, 0)))
        genres_f = jnp.pad(genres_f, ((0, bp - B), (0, 0)))

    kernel = functools.partial(_recommender_kernel, offsets=offsets)
    out = pl.pallas_call(
        kernel,
        out_shape=jax.ShapeDtypeStruct((bp, 1), jnp.float32),
        grid_spec=pltpu.PrefetchScalarGridSpec(
            num_scalar_prefetch=0,
            grid=(bp // tb,),
            in_specs=[
                pl.BlockSpec((tb, 4), lambda i: (i, 0)),        # indices
                pl.BlockSpec((tb, G), lambda i: (i, 0)),        # genres
                pl.BlockSpec((k_disc, hidden), lambda i: (0, 0)),  # W_disc
                pl.BlockSpec((G, hidden), lambda i: (0, 0)),       # W_genre
                pl.BlockSpec((3, hidden), lambda i: (0, 0)),       # biases+w2
            ],
            out_specs=pl.BlockSpec((tb, 1), lambda i: (i, 0)),
        ),
        compiler_params=pltpu.CompilerParams(
            dimension_semantics=("parallel",)),
    )(idx, genres_f, w_disc, w_gen, tail)

    out = out[:B]
    # Matches torch `.squeeze()` for B > 1 (for B == 1 PyTorch would also drop
    # the batch dim).
    return jnp.squeeze(out, axis=-1)


def init_params(key, num_movies, num_genders, num_occupations, num_genres,
                num_age_groups, embedding_dim=EMB_DIM):
    """Parameters in the same form as the PyTorch module."""
    ks = jax.random.split(key, 12)
    u = lambda k, shape, bound: jax.random.uniform(
        k, shape, jnp.float32, minval=-bound, maxval=bound)
    params = {
        # Embedding tables: N(0, 1) like nn.Embedding default.
        "movie_emb": jax.random.normal(ks[0], (num_movies, embedding_dim), jnp.float32),
        "gender_emb": jax.random.normal(ks[1], (num_genders, embedding_dim), jnp.float32),
        "occ_emb": jax.random.normal(ks[2], (num_occupations, embedding_dim), jnp.float32),
        "age_emb": jax.random.normal(ks[3], (num_age_groups, embedding_dim), jnp.float32),
        # Linear layers, stored pre-transposed so forward does x @ W.
        "wg": u(ks[4], (num_genres, embedding_dim), 1.0 / (num_genres ** 0.5)),
        "bg": u(ks[5], (1, embedding_dim), 1.0 / (num_genres ** 0.5)),
        "w1": u(ks[6], (5 * embedding_dim, HIDDEN), 1.0 / ((5 * embedding_dim) ** 0.5)),
        "b1": u(ks[7], (1, HIDDEN), 1.0 / ((5 * embedding_dim) ** 0.5)),
        "w2": u(ks[8], (HIDDEN, 1), 1.0 / (HIDDEN ** 0.5)),
        "b2": u(ks[9], (1, 1), 1.0 / (HIDDEN ** 0.5)),
    }
    return params


def fold_params(params):
    """One-time fold (at init): embeddings + genre Linear merged into fc1."""
    d = EMB_DIM
    hp = jax.lax.Precision.HIGHEST
    mm = lambda a, b: jnp.dot(a, b, precision=hp)
    w1 = params["w1"].astype(jnp.float32)

    w_age = mm(params["age_emb"], w1[0 * d:1 * d, :])
    w_movie = mm(params["movie_emb"], w1[1 * d:2 * d, :])
    w_gender = mm(params["gender_emb"], w1[2 * d:3 * d, :])
    w_occ = mm(params["occ_emb"], w1[3 * d:4 * d, :])
    w_gen = mm(params["wg"], w1[4 * d:5 * d, :])
    b_eff = params["b1"] + mm(params["bg"], w1[4 * d:5 * d, :])

    w_disc = jnp.concatenate([w_age, w_movie, w_gender, w_occ], axis=0)
    n_age = params["age_emb"].shape[0]
    n_mov = params["movie_emb"].shape[0]
    n_gdr = params["gender_emb"].shape[0]
    offsets = (0, n_age, n_age + n_mov, n_age + n_mov + n_gdr)

    w2_row = params["w2"].T                                    # [1, HIDDEN]
    b2_rep = jnp.broadcast_to(params["b2"], (1, HIDDEN))
    tail = jnp.concatenate([b_eff, w2_row, b2_rep], axis=0)    # [3, HIDDEN]

    folded = {
        "w_disc": w_disc.astype(jnp.float32),
        "w_gen": w_gen.astype(jnp.float32),
        "tail": tail.astype(jnp.float32),
    }
    return folded, offsets


if __name__ == "__main__":
    # Small synthetic sizes consistent with the module's __init__.
    num_movies = 20
    num_genders = 2
    num_occupations = 21
    num_genres = 18
    num_age_groups = 7
    B = 8

    key = jax.random.PRNGKey(0)
    kp, k1, k2, k3, k4, k5 = jax.random.split(key, 6)

    params = init_params(kp, num_movies, num_genders, num_occupations,
                         num_genres, num_age_groups)
    folded, offsets = fold_params(params)

    age_group = jax.random.randint(k1, (B,), 0, num_age_groups)
    movie = jax.random.randint(k2, (B,), 0, num_movies)
    gender = jax.random.randint(k3, (B,), 0, num_genders)
    occupation = jax.random.randint(k4, (B,), 0, num_occupations)
    genres = (jax.random.uniform(k5, (B, num_genres)) < 0.3).astype(jnp.float32)

    rating = federated_recommender_forward(
        folded["w_disc"], folded["w_gen"], folded["tail"],
        age_group, movie, gender, occupation, genres,
        offsets=offsets, block_b=256)
    jax.block_until_ready(rating)

    # Pure-JAX reference mirroring the PyTorch forward exactly (unfolded).
    def ref_forward(p, ag, mv, gd, oc, gn):
        hp = jax.lax.Precision.HIGHEST
        a = jnp.take(p["age_emb"], ag, axis=0)
        m = jnp.take(p["movie_emb"], mv, axis=0)
        g = jnp.take(p["gender_emb"], gd, axis=0)
        o = jnp.take(p["occ_emb"], oc, axis=0)
        ge = jnp.dot(gn.astype(jnp.float32), p["wg"], precision=hp) + p["bg"]
        x = jnp.concatenate([a, m, g, o, ge], axis=-1)
        h = jnp.maximum(jnp.dot(x, p["w1"], precision=hp) + p["b1"], 0.0)
        return jnp.squeeze(jnp.dot(h, p["w2"], precision=hp) + p["b2"], axis=-1)

    ref = ref_forward(params, age_group, movie, gender, occupation, genres)
    assert rating.shape == (B,)
    assert jnp.allclose(rating, ref, atol=1e-4, rtol=1e-4), (
        jnp.max(jnp.abs(rating - ref)))

    print("KERNEL_OK")
</pallas_src>

<mosaic_0001>
module attributes {stable_mosaic.version = 11 : i64} {
  func.func @_recommender_kernel(%arg0: i32, %arg1: memref<8x4xi32, #tpu.memory_space<vmem>>, %arg2: memref<8x18xf32, #tpu.memory_space<vmem>>, %arg3: memref<50x128xf32, #tpu.memory_space<vmem>>, %arg4: memref<18x128xf32, #tpu.memory_space<vmem>>, %arg5: memref<3x128xf32, #tpu.memory_space<vmem>>, %arg6: memref<8x1xf32, #tpu.memory_space<vmem>>) attributes {dimension_semantics = [#tpu.dimension_semantics<parallel>], iteration_bounds = array<i64: 1>, scalar_prefetch = 0 : i64, scratch_operands = 0 : i64, tpu.core_type = #tpu.core_type<tc>, window_params = [{transform_indices = @transform_0, window_bounds = array<i64: 8, 4>}, {transform_indices = @transform_1, window_bounds = array<i64: 8, 18>}, {pipeline_mode = #tpu.pipeline_mode<synchronous>, transform_indices = @transform_2, window_bounds = array<i64: 50, 128>}, {pipeline_mode = #tpu.pipeline_mode<synchronous>, transform_indices = @transform_3, window_bounds = array<i64: 18, 128>}, {pipeline_mode = #tpu.pipeline_mode<synchronous>, transform_indices = @transform_4, window_bounds = array<i64: 3, 128>}, {transform_indices = @transform_5, window_bounds = array<i64: 8, 1>}]} {
    %0 = tpu.iota {dimensions = array<i32: 1>} : vector<8x50xi32>
    %c0 = arith.constant 0 : index
    %c0_0 = arith.constant 0 : index
    %1 = vector.load %arg1[%c0, %c0_0] : memref<8x4xi32, #tpu.memory_space<vmem>>, vector<8x4xi32>
    %cst = arith.constant 0.000000e+00 : f32
    %2 = vector.broadcast %cst : f32 to vector<8x50xf32>
    %3 = vector.extract_strided_slice %1 {offsets = [0, 0], sizes = [8, 1], strides = [1, 1]} : vector<8x4xi32> to vector<8x1xi32>
    %c0_i32 = arith.constant 0 : i32
    %4 = vector.broadcast %c0_i32 : i32 to vector<8x1xi32>
    %5 = arith.addi %3, %4 : vector<8x1xi32>
    %6 = vector.broadcast %5 : vector<8x1xi32> to vector<8x50xi32>
    %7 = arith.cmpi eq, %0, %6 : vector<8x50xi32>
    %8 = arith.extui %7 : vector<8x50xi1> to vector<8x50xi32>
    %9 = arith.sitofp %8 : vector<8x50xi32> to vector<8x50xf32>
    %10 = arith.addf %2, %9 : vector<8x50xf32>
    %11 = vector.extract_strided_slice %1 {offsets = [0, 1], sizes = [8, 1], strides = [1, 1]} : vector<8x4xi32> to vector<8x1xi32>
    %c7_i32 = arith.constant 7 : i32
    %12 = vector.broadcast %c7_i32 : i32 to vector<8x1xi32>
    %13 = arith.addi %11, %12 : vector<8x1xi32>
    %14 = vector.broadcast %13 : vector<8x1xi32> to vector<8x50xi32>
    %15 = arith.cmpi eq, %0, %14 : vector<8x50xi32>
    %16 = arith.extui %15 : vector<8x50xi1> to vector<8x50xi32>
    %17 = arith.sitofp %16 : vector<8x50xi32> to vector<8x50xf32>
    %18 = arith.addf %10, %17 : vector<8x50xf32>
    %19 = vector.extract_strided_slice %1 {offsets = [0, 2], sizes = [8, 1], strides = [1, 1]} : vector<8x4xi32> to vector<8x1xi32>
    %c27_i32 = arith.constant 27 : i32
    %20 = vector.broadcast %c27_i32 : i32 to vector<8x1xi32>
    %21 = arith.addi %19, %20 : vector<8x1xi32>
    %22 = vector.broadcast %21 : vector<8x1xi32> to vector<8x50xi32>
    %23 = arith.cmpi eq, %0, %22 : vector<8x50xi32>
    %24 = arith.extui %23 : vector<8x50xi1> to vector<8x50xi32>
    %25 = arith.sitofp %24 : vector<8x50xi32> to vector<8x50xf32>
    %26 = arith.addf %18, %25 : vector<8x50xf32>
    %27 = vector.extract_strided_slice %1 {offsets = [0, 3], sizes = [8, 1], strides = [1, 1]} : vector<8x4xi32> to vector<8x1xi32>
    %c29_i32 = arith.constant 29 : i32
    %28 = vector.broadcast %c29_i32 : i32 to vector<8x1xi32>
    %29 = arith.addi %27, %28 : vector<8x1xi32>
    %30 = vector.broadcast %29 : vector<8x1xi32> to vector<8x50xi32>
    %31 = arith.cmpi eq, %0, %30 : vector<8x50xi32>
    %32 = arith.extui %31 : vector<8x50xi1> to vector<8x50xi32>
    %33 = arith.sitofp %32 : vector<8x50xi32> to vector<8x50xf32>
    %34 = arith.addf %26, %33 : vector<8x50xf32>
    %c0_1 = arith.constant 0 : index
    %c0_2 = arith.constant 0 : index
    %35 = vector.load %arg5[%c0_1, %c0_2] : memref<3x128xf32, #tpu.memory_space<vmem>>, vector<1x128xf32>
    %c1 = arith.constant 1 : index
    %c0_3 = arith.constant 0 : index
    %36 = vector.load %arg5[%c1, %c0_3] : memref<3x128xf32, #tpu.memory_space<vmem>>, vector<1x128xf32>
    %c2 = arith.constant 2 : index
    %c0_4 = arith.constant 0 : index
    %37 = vector.load %arg5[%c2, %c0_4] : memref<3x128xf32, #tpu.memory_space<vmem>>, vector<1x1xf32>
    %c0_5 = arith.constant 0 : index
    %c0_6 = arith.constant 0 : index
    %38 = vector.load %arg3[%c0_5, %c0_6] : memref<50x128xf32, #tpu.memory_space<vmem>>, vector<50x128xf32>
    %cst_7 = arith.constant dense<0.000000e+00> : vector<8x128xf32>
    %39 = tpu.matmul %34, %38, %cst_7 {dimension_numbers = #tpu.dot_dimension_numbers<[1], [0], [0], [1], [0, 0, 1, 1], [], []>} : vector<8x50xf32>, vector<50x128xf32>, vector<8x128xf32> -> vector<8x128xf32>
    %c0_8 = arith.constant 0 : index
    %c0_9 = arith.constant 0 : index
    %40 = vector.load %arg2[%c0_8, %c0_9] : memref<8x18xf32, #tpu.memory_space<vmem>>, vector<8x18xf32>
    %c0_10 = arith.constant 0 : index
    %c0_11 = arith.constant 0 : index
    %41 = vector.load %arg4[%c0_10, %c0_11] : memref<18x128xf32, #tpu.memory_space<vmem>>, vector<18x128xf32>
    %cst_12 = arith.constant dense<0.000000e+00> : vector<8x128xf32>
    %42 = tpu.matmul %40, %41, %cst_12 {dimension_numbers = #tpu.dot_dimension_numbers<[1], [0], [0], [1], [0, 0, 1, 1], [], []>} : vector<8x18xf32>, vector<18x128xf32>, vector<8x128xf32> -> vector<8x128xf32>
    %43 = arith.addf %39, %42 : vector<8x128xf32>
    %44 = vector.broadcast %35 : vector<1x128xf32> to vector<8x128xf32>
    %45 = arith.addf %43, %44 : vector<8x128xf32>
    %cst_13 = arith.constant 0.000000e+00 : f32
    %46 = vector.broadcast %cst_13 : f32 to vector<8x128xf32>
    %47 = arith.maximumf %45, %46 : vector<8x128xf32>
    %48 = vector.broadcast %36 : vector<1x128xf32> to vector<8x128xf32>
    %49 = arith.mulf %47, %48 : vector<8x128xf32>
    %cst_14 = arith.constant dense<0.000000e+00> : vector<8xf32>
    %50 = vector.multi_reduction <add>, %49, %cst_14 [1] : vector<8x128xf32> to vector<8xf32>
    %51 = vector.shape_cast %50 : vector<8xf32> to vector<8x1xf32>
    %52 = vector.broadcast %37 : vector<1x1xf32> to vector<8x1xf32>
    %53 = arith.addf %51, %52 : vector<8x1xf32>
    %c0_15 = arith.constant 0 : index
    %c0_16 = arith.constant 0 : index
    %54 = vector.load %arg6[%c0_15, %c0_16] : memref<8x1xf32, #tpu.memory_space<vmem>>, vector<8x1xf32>
    tpu.vector_store %arg6[%c0_15, %c0_16], %53 {strides = array<i32>} : memref<8x1xf32, #tpu.memory_space<vmem>>, vector<8x1xf32>,
    return
  }
  func.func @transform_0(%arg0: i32) -> (i32, i32) {
    %c0_i32 = arith.constant 0 : i32
    %c0_i32_0 = arith.constant 0 : i32
    return %arg0, %c0_i32 : i32, i32
  }
  func.func @transform_1(%arg0: i32) -> (i32, i32) {
    %c0_i32 = arith.constant 0 : i32
    %c0_i32_0 = arith.constant 0 : i32
    return %arg0, %c0_i32 : i32, i32
  }
  func.func @transform_2(%arg0: i32) -> (i32, i32) {
    %c0_i32 = arith.constant 0 : i32
    %c0_i32_0 = arith.constant 0 : i32
    %c0_i32_1 = arith.constant 0 : i32
    return %c0_i32, %c0_i32_0 : i32, i32
  }
  func.func @transform_3(%arg0: i32) -> (i32, i32) {
    %c0_i32 = arith.constant 0 : i32
    %c0_i32_0 = arith.constant 0 : i32
    %c0_i32_1 = arith.constant 0 : i32
    return %c0_i32, %c0_i32_0 : i32, i32
  }
  func.func @transform_4(%arg0: i32) -> (i32, i32) {
    %c0_i32 = arith.constant 0 : i32
    %c0_i32_0 = arith.constant 0 : i32
    %c0_i32_1 = arith.constant 0 : i32
    return %c0_i32, %c0_i32_0 : i32, i32
  }
  func.func @transform_5(%arg0: i32) -> (i32, i32) {
    %c0_i32 = arith.constant 0 : i32
    %c0_i32_0 = arith.constant 0 : i32
    return %arg0, %c0_i32 : i32, i32
  }
}

</mosaic_0001>

<bundles_post_ra>
// kernel: federated_recommender_forward.1
= control target key start
LH: loop header
LB: loop body
LE: loop exit
PB: predicated region body
PF: predicated region fallthrough
CT: control target
= control target key end

     0   :  { %v320_v0 = vmov 0   ;;  %v321_v2 = vmov 2   ;;  %v322_v6 = vmov 0.0|0.0   ;;  %v323_v13 = vmov 1   ;;  %s405_s0 = inlined_call_operand.vmem [shape: s32[8,4], index: 0, kind: input, shape index: {}]   ;;  %s406_s2 = inlined_call_operand.vmem [shape: f32[50,128], index: 2, kind: input, shape index: {}]   ;;  %s407_s3 = inlined_call_operand.vmem [shape: f32[18,128], index: 3, kind: input, shape index: {}]   ;;  %s408_s1 = inlined_call_operand.vmem [shape: f32[8,18], index: 1, kind: input, shape index: {}]   ;;  %s409_s4 = inlined_call_operand.vmem [shape: f32[3,128], index: 4, kind: input, shape index: {}]   ;;  %s410_s5 = inlined_call_operand.vmem [shape: f32[8,1], index: 5, kind: output, shape index: {}]  }
   0x1   :  { %315 = vset.pattern.permute.xlu0 %v320_v0  ;;  %v22_v1 = vld [vmem:[%s405_s0] sm:$0xff]  ;;  %317 = vset.pattern.permute.xlu1 %v321_v2  ;;  %v58_v4 = vld [vmem:[%s406_s2 + $0x8] sm:$0xff]  ;;  %v59_v9 = vld [vmem:[%s406_s2 + $0x10] sm:$0xff]  ;;  %v324_v19 = vmov 3   ;;  %v325_v21 = vmov 0.0   ;;  %vm72_vm0 = vcmask 1041408   ;;  %v20_v25 = vlaneseq }
   0x2   :  { %v57_v3 = vld [vmem:[%s406_s2] sm:$0xff]  ;;  %24 = vperm.xlu0 %315, %v22_v1   ;;  %v38_v5 = vadd.s32 27, %v22_v1  ;;  %299 = vmatprep.subr.bf16.mxu1 %v322_v6  ;;  %v30_v8 = vadd.s32 7, %v22_v1  ;;  %v60_v10 = vld [vmem:[%s406_s2 + $0x18] sm:$0xff]  ;;  %v46_v12 = vadd.s32 29, %v22_v1  ;;  %v66_v15 = vld [vmem:[%s407_s3 + $0x8] sm:$0xff] }
   0x3   :  { %v300_v7 = vpack.c.bf16 %v58_v4, %v57_v3  ;;  %296 = vmatprep.subr.bf16.mxu0 %v322_v6  ;;  %v303_v11 = vpack.c.bf16 %v60_v10, %v59_v9  ;;  %v65_v14 = vld [vmem:[%s407_s3] sm:$0xff]  ;;  %v62_v18 = vld [vmem:[%s406_s2 + $0x28] sm:$0xff]  ;;  %v67_v22 = vld [vmem:[%s407_s3 + $0x10] sm:$0x3]  ;;  %vm326_vm1 = vmmov 0   ;;  %vm68_vm2 = vcmask 146432  }
   0x4   :  { %40 = vperm.xlu1 %317, %v38_v5   ;;  %v297_v16 = vpack.c.bf16 %v66_v15, %v65_v14  ;;  %v61_v17 = vld [vmem:[%s406_s2 + $0x20] sm:$0xff]  ;;  %276 = vmatprep.mubr.msk.f32.mxu0 %vm326_vm1, %v325_v21  ;;  %v63_v24 = vld [vmem:[%s406_s2 + $0x30] sm:$0x3]  ;;  %v21_v26 = vand.u32 127, %v20_v25  ;;  %vm146_vm7 = vcmask 408576   ;;  %vm241_vm8 = vcmask 7168  }
   0x5   :  { %301 = vmatpush3.bf16.msra.mxu1 %v300_v7  ;;  %v306_v20 = vpack.c.bf16 %v62_v18, %v61_v17  ;;  %v64_v23 = vld [vmem:[%s408_s1] sm:$0xff]  ;;  %293 = vmatprep.mubr.msk.f32.mxu1 %vm326_vm1, %v325_v21 }
   0x6   :  { %302 = vmatprep.subr.bf16.mxu1 %v322_v6  ;;  %316 = vset.pattern.permute.xlu0 %v323_v13  ;;  %v255_v40 = vld [vmem:[%s409_s4] ss:$0 sm:$0xff]  ;;  %v256_v45 = vld [vmem:[%s409_s4 + $0x1] ss:$0 sm:$0xff]  ;;  %v257_v48 = vld [vmem:[%s409_s4 + $0x2] ss:$0 sm:$0xff] }
   0x7   :  { %32 = vperm.xlu0 %316, %v30_v8   ;;  %298 = vmatpush3.bf16.msra.mxu0 %v297_v16 }
   0x8   :  { %318 = vset.pattern.permute.xlu1 %v324_v19  ;;  %274 = vmatprep.subr.mxu0 %v325_v21 }
   0x9   :  { %304 = vmatpush3.bf16.msra.mxu1 %v303_v11  ;;  %48 = vperm.xlu1 %318, %v46_v12  }
   0xa   :  { %305 = vmatprep.subr.bf16.mxu1 %v322_v6 }
   0xb   :  { %319 = vset.pattern.permute.xlu0 %v324_v19  ;;  %275 = vmatpush3.msk.msra.mxu0 %vm72_vm0, %v67_v22 }
   0xc   :  { %277 = vmatmul.mubr.msk.f32.vlgmr.msra.gmra.mrb[0].mxu0 %vm68_vm2, %v64_v23 }
   0xd   :  { %307 = vmatpush3.bf16.msra.mxu1 %v306_v20 }
   0xe   :  { %291 = vmatprep.subr.mxu1 %v325_v21 }
  0x11   :  { %292 = vmatpush3.msk.msra.mxu1 %vm72_vm0, %v63_v24 }
  0x81   :  { %v25_v27 = vpop.permute.xlu0 %24 }
  0x82   :  { %vm26_vm3 = vcmp.eq.s32.totalorder %v21_v26, %v25_v27 }
  0x83   :  { %v41_v28 = vpop.permute.xlu1 %40  ;;  %v247_v30 = vsel %vm26_vm3, 1.0, %v325_v21 }
  0x84   :  { %vm42_vm4 = vcmp.eq.s32.totalorder %v21_v26, %v41_v28 }
  0x85   :  { %v249_v34 = vsel %vm42_vm4, 1.0, %v325_v21 }
  0x86   :  { %v33_v29 = vpop.permute.xlu0 %32 }
  0x87   :  { %vm34_vm5 = vcmp.eq.s32.totalorder %v21_v26, %v33_v29 }
  0x88   :  { %v248_v31 = vsel %vm34_vm5, 1.0, %v325_v21  ;;  %v49_v32 = vpop.permute.xlu1 %48 }
  0x89   :  { %v37_v33 = vadd.f32 %v248_v31, %v247_v30  ;;  %vm50_vm6 = vcmp.eq.s32.totalorder %v21_v26, %v49_v32 }
  0x8a   :  { %v250_v35 = vsel %vm50_vm6, 1.0, %v325_v21 }
  0x8b   :  { %v45_v36 = vadd.f32 %v249_v34, %v37_v33 }
  0x8d   :  { %v53_v37 = vadd.f32 %v250_v35, %v45_v36 }
  0x8f   :  { %294 = vmatmul.mubr.msk.f32.vlgmr.msra.gmra.mrb[0].mxu1 %vm146_vm7, %v53_v37 }
  0xdf   :  { %v142_v38 = vpop.f32.mrb[0].mxu0 }
  0xe0   :  { %v278_v39 = vpop.f32.mrb[1].mxu0 }
 0x162   :  { %v219_v41 = vpop.f32.mrb[0].mxu1 }
 0x163   :  { %v220_v42 = vadd.f32 %v219_v41, %v142_v38  ;;  %v295_v43 = vpop.f32.mrb[1].mxu1 }
 0x165   :  { %v227_v44 = vadd.f32 %v255_v40, %v220_v42 }
 0x167   :  { %v228_v46 = vmax.f32 %v227_v44, 0.0 }
 0x169   :  { %v233_v47 = vmul.f32 %v256_v45, %v228_v46 }
 0x16b   :  { %234 = vadd.xlane.f32.xlu1 %v233_v47 }
 0x1f8   :  { %v235_v49 = vpop.xlane.xlu1 %234 }
 0x1f9   :  { %v240_v50 = vadd.f32 %v257_v48, %v235_v49 }
 0x1fb   :  { %242 = vst.msk [vmem:[%s410_s5] sm:$0xff] %vm241_vm8, %v240_v50 }

</bundles_post_ra>
